<compile_context>
chip_gen: v6e
topology: v6e:2x2x1
jax: 0.10.0
libtpu: 0.0.40
codegen_flags: <defaults>
</compile_context>

<pallas_src>
import functools
import math

import jax
import jax.numpy as jnp
from jax import lax
from jax.experimental import pallas as pl
from jax.experimental.pallas import tpu as pltpu


# -----------------------------------------------------------------------------
# Kernel
# -----------------------------------------------------------------------------
def _attn_block_kernel(x_ref, y_ref, w_ref, vec_ref, o_ref, *, n_heads, eps):
    x = x_ref[...]                       # (TQ, H)   query-side tile, native dtype
    y = y_ref[...]                       # (Skv, H)  key/value side, native dtype
    tq, hidden = x.shape
    hd = hidden // n_heads
    cdt = x.dtype                        # MXU operand dtype (bf16 fast path if caller passes bf16)
    inv_sqrt_d = 1.0 / math.sqrt(hd)

    bq = vec_ref[0:1, :].astype(jnp.float32)
    bk = vec_ref[1:2, :].astype(jnp.float32)
    bv = vec_ref[2:3, :].astype(jnp.float32)
    bm = vec_ref[3:4, :].astype(jnp.float32)
    gamma = vec_ref[4:5, :].astype(jnp.float32)
    beta = vec_ref[5:6, :].astype(jnp.float32)

    # QKV projections: native-dtype operands on the MXU, f32 accumulation.
    q = jnp.dot(x, w_ref[0], preferred_element_type=jnp.float32) + bq
    k = jnp.dot(y, w_ref[1], preferred_element_type=jnp.float32) + bk
    v = jnp.dot(y, w_ref[2], preferred_element_type=jnp.float32) + bv
    # Fold 1/sqrt(d) into q once (cheaper than scaling every (TQ, Skv) score tile).
    q = (q * inv_sqrt_d).astype(cdt)
    k = k.astype(cdt)
    v = v.astype(cdt)

    # Contract the head dim of q and k directly -> no explicit .T / XLU transpose per head.
    dn_qk = (((1,), (1,)), ((), ()))

    merged = jnp.zeros((tq, hidden), jnp.float32)
    for h in range(n_heads):             # static unroll; merge projection accumulated per head
        lo, hi = h * hd, (h + 1) * hd
        qh = q[:, lo:hi]                  # (TQ, hd)
        kh = k[:, lo:hi]                  # (Skv, hd)
        vh = v[:, lo:hi]                  # (Skv, hd)
        s = lax.dot_general(qh, kh, dimension_numbers=dn_qk,
                            preferred_element_type=jnp.float32)      # (TQ, Skv)
        s = s - jnp.max(s, axis=-1, keepdims=True)
        p = jnp.exp(s)                                                # unnormalized probabilities
        inv_l = 1.0 / jnp.sum(p, axis=-1, keepdims=True)              # (TQ, 1)
        oh = jnp.dot(p.astype(cdt), vh, preferred_element_type=jnp.float32)   # (TQ, hd)
        oh = (oh * inv_l).astype(cdt)                                 # normalize the small head tile
        # concat-free merge:  att @ Wm == sum_h head_h @ Wm[h*hd:(h+1)*hd, :]
        merged = merged + jnp.dot(oh, w_ref[3, lo:hi, :],
                                  preferred_element_type=jnp.float32)
    merged = merged + bm

    # Residual + LayerNorm in f32.
    res = x.astype(jnp.float32) + merged
    mean = jnp.mean(res, axis=-1, keepdims=True)
    cen = res - mean
    var = jnp.mean(cen * cen, axis=-1, keepdims=True)
    normed = cen * lax.rsqrt(var + eps)
    o_ref[...] = (normed * gamma + beta).astype(o_ref.dtype)


# -----------------------------------------------------------------------------
# pallas_call builder / wrappers
# -----------------------------------------------------------------------------
def _vmem_budget(tq, skv, hidden, itemsize):
    """Explicit VMEM budget: double-buffered activation tiles + parameter blocks + f32 temps."""
    io_blocks = 2 * itemsize * (2 * tq * hidden + skv * hidden)          # x / out / y (double buffered)
    weights = 2 * itemsize * (4 * hidden * hidden + 6 * hidden)          # packed W + vec (conservative)
    temps = 4 * (3 * (tq + skv) * hidden + tq * skv + 4 * tq * hidden)   # f32 q/k/v, scores, merged, res
    budget = io_blocks + weights + temps + (4 << 20)                     # headroom for Mosaic scratch
    return int(max(16 << 20, min(budget, 64 << 20)))                     # cap at v7x physical VMEM


@functools.lru_cache(maxsize=None)
def _build_attn_block(batch, sq, skv, hidden, n_heads, dtype_name, eps, q_tile):
    dtype = jnp.dtype(dtype_name)
    tq = sq if sq <= q_tile else q_tile                                  # q_tile is a multiple of 8
    grid = (batch, pl.cdiv(sq, tq))
    kernel = functools.partial(_attn_block_kernel, n_heads=n_heads, eps=eps)
    return pl.pallas_call(
        kernel,
        out_shape=jax.ShapeDtypeStruct((batch, sq, hidden), dtype),
        grid=grid,
        in_specs=[
            pl.BlockSpec((None, tq, hidden), lambda b, t: (b, t, 0)),    # x: one query tile
            pl.BlockSpec((None, skv, hidden), lambda b, t: (b, 0, 0)),   # y: full KV row of this batch
            pl.BlockSpec((4, hidden, hidden), lambda b, t: (0, 0, 0)),   # packed Wq/Wk/Wv/Wm (grid-invariant)
            pl.BlockSpec((6, hidden), lambda b, t: (0, 0)),              # packed bq/bk/bv/bm/gamma/beta
        ],
        out_specs=pl.BlockSpec((None, tq, hidden), lambda b, t: (b, t, 0)),
        compiler_params=pltpu.CompilerParams(
            dimension_semantics=("parallel", "parallel"),
            vmem_limit_bytes=_vmem_budget(tq, skv, hidden, dtype.itemsize)),
    )


def attention_block(x, y, w, vec, *, n_heads, eps=1e-5, q_tile=256):
    """LayerNorm(x + MHA(q=x, kv=y)).  SA when y is x, DPA (cross-attention) otherwise."""
    batch, sq, hidden = x.shape
    assert y.shape[0] == batch and y.shape[2] == hidden
    assert hidden % n_heads == 0
    assert w.shape == (4, hidden, hidden) and vec.shape == (6, hidden)
    assert x.dtype == y.dtype == w.dtype == vec.dtype
    call = _build_attn_block(batch, sq, y.shape[1], hidden, n_heads,
                             jnp.dtype(x.dtype).name, float(eps), int(q_tile))
    return call(x, y, w, vec)


def encoder_cross_att_forward(protein_vector, compound_vector, params, *, n_heads):
    """Mirrors encoder_cross_att.forward (eval mode)."""
    for layer in params:                                # encoder SA stack on compound
        compound_vector = attention_block(compound_vector, compound_vector,
                                          *layer["enc"], n_heads=n_heads)
    for layer in params:                                # decoder SA + cross-attention DPA on protein
        protein_vector = attention_block(protein_vector, protein_vector,
                                         *layer["dec_sa"], n_heads=n_heads)
        protein_vector = attention_block(protein_vector, compound_vector,
                                         *layer["dec_coa"], n_heads=n_heads)
    return protein_vector, compound_vector


# -----------------------------------------------------------------------------
# Pure-JAX reference (mirrors the PyTorch forward, f32 math)
# -----------------------------------------------------------------------------
def _attn_block_ref(x, y, w, vec, *, n_heads, eps=1e-5):
    batch, sq, hidden = x.shape
    skv = y.shape[1]
    hd = hidden // n_heads
    x32, y32 = x.astype(jnp.float32), y.astype(jnp.float32)
    w32, v32 = w.astype(jnp.float32), vec.astype(jnp.float32)
    q = x32 @ w32[0] + v32[0]
    k = y32 @ w32[1] + v32[1]
    v = y32 @ w32[2] + v32[2]
    q = q.reshape(batch, sq, n_heads, hd).transpose(0, 2, 1, 3)
    k = k.reshape(batch, skv, n_heads, hd).transpose(0, 2, 1, 3)
    v = v.reshape(batch, skv, n_heads, hd).transpose(0, 2, 1, 3)
    s = jnp.einsum("bhqd,bhkd->bhqk", q, k) / math.sqrt(hd)
    p = jax.nn.softmax(s, axis=-1)
    att = jnp.einsum("bhqk,bhkd->bhqd", p, v).transpose(0, 2, 1, 3).reshape(batch, sq, hidden)
    merged = att @ w32[3] + v32[3]
    res = x32 + merged
    mean = jnp.mean(res, axis=-1, keepdims=True)
    var = jnp.mean((res - mean) ** 2, axis=-1, keepdims=True)
    out = (res - mean) / jnp.sqrt(var + eps) * v32[4] + v32[5]
    return out.astype(x.dtype)


def encoder_cross_att_ref(protein_vector, compound_vector, params, *, n_heads):
    for layer in params:
        compound_vector = _attn_block_ref(compound_vector, compound_vector,
                                          *layer["enc"], n_heads=n_heads)
    for layer in params:
        protein_vector = _attn_block_ref(protein_vector, protein_vector,
                                         *layer["dec_sa"], n_heads=n_heads)
        protein_vector = _attn_block_ref(protein_vector, compound_vector,
                                         *layer["dec_coa"], n_heads=n_heads)
    return protein_vector, compound_vector


# -----------------------------------------------------------------------------
# Parameter helpers
# -----------------------------------------------------------------------------
def init_params(key, hid_dim, layers):
    """Per layer: 'enc', 'dec_sa', 'dec_coa' blocks, each (W:(4,H,H), vec:(6,H))."""
    scale = 1.0 / math.sqrt(hid_dim)

    def one_block(k):
        kw, kb = jax.random.split(k)
        w = jax.random.uniform(kw, (4, hid_dim, hid_dim), jnp.float32, -scale, scale)
        b = jax.random.uniform(kb, (4, hid_dim), jnp.float32, -scale, scale)
        gamma = jnp.ones((1, hid_dim), jnp.float32)
        beta = jnp.zeros((1, hid_dim), jnp.float32)
        vec = jnp.concatenate([b, gamma, beta], axis=0)   # (6, H): bq, bk, bv, bm, gamma, beta
        return w, vec

    keys = jax.random.split(key, 3 * layers)
    params = []
    for i in range(layers):
        params.append({
            "enc": one_block(keys[3 * i + 0]),
            "dec_sa": one_block(keys[3 * i + 1]),
            "dec_coa": one_block(keys[3 * i + 2]),
        })
    return params


def cast_params(params, dtype):
    return [{name: (w.astype(dtype), vec.astype(dtype)) for name, (w, vec) in layer.items()}
            for layer in params]


def _max_abs_err(a, b):
    return float(jnp.max(jnp.abs(a.astype(jnp.float32) - b.astype(jnp.float32))))


# -----------------------------------------------------------------------------
# Self-test
# -----------------------------------------------------------------------------
if __name__ == "__main__":
    B, S_PROT, S_COMP, H, NH, LAYERS = 2, 8, 16, 32, 4, 2

    key = jax.random.PRNGKey(0)
    kp, kc, kparam = jax.random.split(key, 3)
    protein = jax.random.normal(kp, (B, S_PROT, H), jnp.float32)
    compound = jax.random.normal(kc, (B, S_COMP, H), jnp.float32)
    params = init_params(kparam, H, LAYERS)

    # --- f32 path (tight tolerance vs pure-JAX reference) ---
    p_out, c_out = jax.block_until_ready(
        encoder_cross_att_forward(protein, compound, params, n_heads=NH))
    p_ref, c_ref = encoder_cross_att_ref(protein, compound, params, n_heads=NH)
    assert p_out.shape == (B, S_PROT, H) and c_out.shape == (B, S_COMP, H)
    err_f32 = max(_max_abs_err(p_out, p_ref), _max_abs_err(c_out, c_ref))
    assert err_f32 < 1e-3, f"f32 mismatch vs reference: {err_f32}"

    # --- bf16 fast path (bf16 MXU operands, f32 accumulation; loose tolerance) ---
    bf = jnp.bfloat16
    protein_b, compound_b = protein.astype(bf), compound.astype(bf)
    params_b = cast_params(params, bf)
    pb, cb = jax.block_until_ready(
        encoder_cross_att_forward(protein_b, compound_b, params_b, n_heads=NH))
    pbr, cbr = encoder_cross_att_ref(protein_b, compound_b, params_b, n_heads=NH)
    assert bool(jnp.all(jnp.isfinite(pb.astype(jnp.float32)))), "non-finite bf16 output"
    assert bool(jnp.all(jnp.isfinite(cb.astype(jnp.float32)))), "non-finite bf16 output"
    err_bf16 = max(_max_abs_err(pb, pbr), _max_abs_err(cb, cbr))
    assert err_bf16 < 2e-1, f"bf16 mismatch vs reference: {err_bf16}"

    print("KERNEL_OK")
</pallas_src>

<mosaic_0001>
module attributes {stable_mosaic.version = 11 : i64} {
  func.func @_attn_block_kernel(%arg0: i32, %arg1: i32, %arg2: memref<1x16x32xf32, #tpu.memory_space<vmem>>, %arg3: memref<1x16x32xf32, #tpu.memory_space<vmem>>, %arg4: memref<4x32x32xf32, #tpu.memory_space<vmem>>, %arg5: memref<6x32xf32, #tpu.memory_space<vmem>>, %arg6: memref<1x16x32xf32, #tpu.memory_space<vmem>>) attributes {dimension_semantics = [#tpu.dimension_semantics<parallel>, #tpu.dimension_semantics<parallel>], iteration_bounds = array<i64: 2, 1>, scalar_prefetch = 0 : i64, scratch_operands = 0 : i64, tpu.core_type = #tpu.core_type<tc>, window_params = [{transform_indices = @transform_0, window_bounds = array<i64: 1, 16, 32>}, {transform_indices = @transform_1, window_bounds = array<i64: 1, 16, 32>}, {pipeline_mode = #tpu.pipeline_mode<synchronous>, transform_indices = @transform_2, window_bounds = array<i64: 4, 32, 32>}, {pipeline_mode = #tpu.pipeline_mode<synchronous>, transform_indices = @transform_3, window_bounds = array<i64: 6, 32>}, {transform_indices = @transform_4, window_bounds = array<i64: 1, 16, 32>}]} {
    %c0 = arith.constant 0 : index
    %c0_0 = arith.constant 0 : index
    %c0_1 = arith.constant 0 : index
    %0 = vector.load %arg2[%c0, %c0_0, %c0_1] : memref<1x16x32xf32, #tpu.memory_space<vmem>>, vector<1x16x32xf32>
    %1 = vector.shape_cast %0 : vector<1x16x32xf32> to vector<16x32xf32>
    %c0_2 = arith.constant 0 : index
    %c0_3 = arith.constant 0 : index
    %c0_4 = arith.constant 0 : index
    %2 = vector.load %arg3[%c0_2, %c0_3, %c0_4] : memref<1x16x32xf32, #tpu.memory_space<vmem>>, vector<1x16x32xf32>
    %3 = vector.shape_cast %2 : vector<1x16x32xf32> to vector<16x32xf32>
    %c0_5 = arith.constant 0 : index
    %c0_6 = arith.constant 0 : index
    %4 = vector.load %arg5[%c0_5, %c0_6] : memref<6x32xf32, #tpu.memory_space<vmem>>, vector<1x32xf32>
    %c1 = arith.constant 1 : index
    %c0_7 = arith.constant 0 : index
    %5 = vector.load %arg5[%c1, %c0_7] : memref<6x32xf32, #tpu.memory_space<vmem>>, vector<1x32xf32>
    %c2 = arith.constant 2 : index
    %c0_8 = arith.constant 0 : index
    %6 = vector.load %arg5[%c2, %c0_8] : memref<6x32xf32, #tpu.memory_space<vmem>>, vector<1x32xf32>
    %c3 = arith.constant 3 : index
    %c0_9 = arith.constant 0 : index
    %7 = vector.load %arg5[%c3, %c0_9] : memref<6x32xf32, #tpu.memory_space<vmem>>, vector<1x32xf32>
    %c4 = arith.constant 4 : index
    %c0_10 = arith.constant 0 : index
    %8 = vector.load %arg5[%c4, %c0_10] : memref<6x32xf32, #tpu.memory_space<vmem>>, vector<1x32xf32>
    %c5 = arith.constant 5 : index
    %c0_11 = arith.constant 0 : index
    %9 = vector.load %arg5[%c5, %c0_11] : memref<6x32xf32, #tpu.memory_space<vmem>>, vector<1x32xf32>
    %c0_12 = arith.constant 0 : index
    %c0_13 = arith.constant 0 : index
    %c0_14 = arith.constant 0 : index
    %10 = vector.load %arg4[%c0_12, %c0_13, %c0_14] : memref<4x32x32xf32, #tpu.memory_space<vmem>>, vector<1x32x32xf32>
    %11 = vector.shape_cast %10 : vector<1x32x32xf32> to vector<32x32xf32>
    %cst = arith.constant dense<0.000000e+00> : vector<16x32xf32>
    %12 = tpu.matmul %1, %11, %cst {dimension_numbers = #tpu.dot_dimension_numbers<[1], [0], [0], [1], [0, 0, 1, 1], [], []>} : vector<16x32xf32>, vector<32x32xf32>, vector<16x32xf32> -> vector<16x32xf32>
    %13 = vector.broadcast %4 : vector<1x32xf32> to vector<16x32xf32>
    %14 = arith.addf %12, %13 : vector<16x32xf32>
    %c1_15 = arith.constant 1 : index
    %c0_16 = arith.constant 0 : index
    %c0_17 = arith.constant 0 : index
    %15 = vector.load %arg4[%c1_15, %c0_16, %c0_17] : memref<4x32x32xf32, #tpu.memory_space<vmem>>, vector<1x32x32xf32>
    %16 = vector.shape_cast %15 : vector<1x32x32xf32> to vector<32x32xf32>
    %cst_18 = arith.constant dense<0.000000e+00> : vector<16x32xf32>
    %17 = tpu.matmul %3, %16, %cst_18 {dimension_numbers = #tpu.dot_dimension_numbers<[1], [0], [0], [1], [0, 0, 1, 1], [], []>} : vector<16x32xf32>, vector<32x32xf32>, vector<16x32xf32> -> vector<16x32xf32>
    %18 = vector.broadcast %5 : vector<1x32xf32> to vector<16x32xf32>
    %19 = arith.addf %17, %18 : vector<16x32xf32>
    %c2_19 = arith.constant 2 : index
    %c0_20 = arith.constant 0 : index
    %c0_21 = arith.constant 0 : index
    %20 = vector.load %arg4[%c2_19, %c0_20, %c0_21] : memref<4x32x32xf32, #tpu.memory_space<vmem>>, vector<1x32x32xf32>
    %21 = vector.shape_cast %20 : vector<1x32x32xf32> to vector<32x32xf32>
    %cst_22 = arith.constant dense<0.000000e+00> : vector<16x32xf32>
    %22 = tpu.matmul %3, %21, %cst_22 {dimension_numbers = #tpu.dot_dimension_numbers<[1], [0], [0], [1], [0, 0, 1, 1], [], []>} : vector<16x32xf32>, vector<32x32xf32>, vector<16x32xf32> -> vector<16x32xf32>
    %23 = vector.broadcast %6 : vector<1x32xf32> to vector<16x32xf32>
    %24 = arith.addf %22, %23 : vector<16x32xf32>
    %cst_23 = arith.constant 0.353553385 : f32
    %25 = vector.broadcast %cst_23 : f32 to vector<16x32xf32>
    %26 = arith.mulf %14, %25 : vector<16x32xf32>
    %cst_24 = arith.constant 0.000000e+00 : f32
    %27 = vector.broadcast %cst_24 : f32 to vector<16x32xf32>
    %28 = vector.extract_strided_slice %26 {offsets = [0, 0], sizes = [16, 8], strides = [1, 1]} : vector<16x32xf32> to vector<16x8xf32>
    %29 = vector.extract_strided_slice %19 {offsets = [0, 0], sizes = [16, 8], strides = [1, 1]} : vector<16x32xf32> to vector<16x8xf32>
    %30 = vector.extract_strided_slice %24 {offsets = [0, 0], sizes = [16, 8], strides = [1, 1]} : vector<16x32xf32> to vector<16x8xf32>
    %cst_25 = arith.constant dense<0.000000e+00> : vector<16x16xf32>
    %31 = tpu.matmul %28, %29, %cst_25 {dimension_numbers = #tpu.dot_dimension_numbers<[1], [1], [0], [0], [0, 0, 1, 0], [], []>} : vector<16x8xf32>, vector<16x8xf32>, vector<16x16xf32> -> vector<16x16xf32>
    %cst_26 = arith.constant dense<0xFF800000> : vector<16xf32>
    %32 = vector.multi_reduction <maximumf>, %31, %cst_26 [1] : vector<16x16xf32> to vector<16xf32>
    %33 = vector.shape_cast %32 : vector<16xf32> to vector<16x1xf32>
    %34 = vector.broadcast %33 : vector<16x1xf32> to vector<16x16xf32>
    %35 = arith.subf %31, %34 : vector<16x16xf32>
    %36 = math.exp %35 : vector<16x16xf32>
    %cst_27 = arith.constant dense<0.000000e+00> : vector<16xf32>
    %37 = vector.multi_reduction <add>, %36, %cst_27 [1] : vector<16x16xf32> to vector<16xf32>
    %38 = vector.shape_cast %37 : vector<16xf32> to vector<16x1xf32>
    %cst_28 = arith.constant 1.000000e+00 : f32
    %39 = vector.broadcast %cst_28 : f32 to vector<16x1xf32>
    %40 = arith.divf %39, %38 : vector<16x1xf32>
    %cst_29 = arith.constant dense<0.000000e+00> : vector<16x8xf32>
    %41 = tpu.matmul %36, %30, %cst_29 {dimension_numbers = #tpu.dot_dimension_numbers<[1], [0], [0], [1], [0, 0, 1, 1], [], []>} : vector<16x16xf32>, vector<16x8xf32>, vector<16x8xf32> -> vector<16x8xf32>
    %42 = vector.broadcast %40 : vector<16x1xf32> to vector<16x8xf32>
    %43 = arith.mulf %41, %42 : vector<16x8xf32>
    %c3_30 = arith.constant 3 : index
    %c0_31 = arith.constant 0 : index
    %c0_32 = arith.constant 0 : index
    %44 = vector.load %arg4[%c3_30, %c0_31, %c0_32] : memref<4x32x32xf32, #tpu.memory_space<vmem>>, vector<1x8x32xf32>
    %45 = vector.shape_cast %44 : vector<1x8x32xf32> to vector<8x32xf32>
    %cst_33 = arith.constant dense<0.000000e+00> : vector<16x32xf32>
    %46 = tpu.matmul %43, %45, %cst_33 {dimension_numbers = #tpu.dot_dimension_numbers<[1], [0], [0], [1], [0, 0, 1, 1], [], []>} : vector<16x8xf32>, vector<8x32xf32>, vector<16x32xf32> -> vector<16x32xf32>
    %47 = arith.addf %27, %46 : vector<16x32xf32>
    %48 = vector.extract_strided_slice %26 {offsets = [0, 8], sizes = [16, 8], strides = [1, 1]} : vector<16x32xf32> to vector<16x8xf32>
    %49 = vector.extract_strided_slice %19 {offsets = [0, 8], sizes = [16, 8], strides = [1, 1]} : vector<16x32xf32> to vector<16x8xf32>
    %50 = vector.extract_strided_slice %24 {offsets = [0, 8], sizes = [16, 8], strides = [1, 1]} : vector<16x32xf32> to vector<16x8xf32>
    %cst_34 = arith.constant dense<0.000000e+00> : vector<16x16xf32>
    %51 = tpu.matmul %48, %49, %cst_34 {dimension_numbers = #tpu.dot_dimension_numbers<[1], [1], [0], [0], [0, 0, 1, 0], [], []>} : vector<16x8xf32>, vector<16x8xf32>, vector<16x16xf32> -> vector<16x16xf32>
    %cst_35 = arith.constant dense<0xFF800000> : vector<16xf32>
    %52 = vector.multi_reduction <maximumf>, %51, %cst_35 [1] : vector<16x16xf32> to vector<16xf32>
    %53 = vector.shape_cast %52 : vector<16xf32> to vector<16x1xf32>
    %54 = vector.broadcast %53 : vector<16x1xf32> to vector<16x16xf32>
    %55 = arith.subf %51, %54 : vector<16x16xf32>
    %56 = math.exp %55 : vector<16x16xf32>
    %cst_36 = arith.constant dense<0.000000e+00> : vector<16xf32>
    %57 = vector.multi_reduction <add>, %56, %cst_36 [1] : vector<16x16xf32> to vector<16xf32>
    %58 = vector.shape_cast %57 : vector<16xf32> to vector<16x1xf32>
    %cst_37 = arith.constant 1.000000e+00 : f32
    %59 = vector.broadcast %cst_37 : f32 to vector<16x1xf32>
    %60 = arith.divf %59, %58 : vector<16x1xf32>
    %cst_38 = arith.constant dense<0.000000e+00> : vector<16x8xf32>
    %61 = tpu.matmul %56, %50, %cst_38 {dimension_numbers = #tpu.dot_dimension_numbers<[1], [0], [0], [1], [0, 0, 1, 1], [], []>} : vector<16x16xf32>, vector<16x8xf32>, vector<16x8xf32> -> vector<16x8xf32>
    %62 = vector.broadcast %60 : vector<16x1xf32> to vector<16x8xf32>
    %63 = arith.mulf %61, %62 : vector<16x8xf32>
    %c3_39 = arith.constant 3 : index
    %c8 = arith.constant 8 : index
    %c0_40 = arith.constant 0 : index
    %64 = vector.load %arg4[%c3_39, %c8, %c0_40] : memref<4x32x32xf32, #tpu.memory_space<vmem>>, vector<1x8x32xf32>
    %65 = vector.shape_cast %64 : vector<1x8x32xf32> to vector<8x32xf32>
    %cst_41 = arith.constant dense<0.000000e+00> : vector<16x32xf32>
    %66 = tpu.matmul %63, %65, %cst_41 {dimension_numbers = #tpu.dot_dimension_numbers<[1], [0], [0], [1], [0, 0, 1, 1], [], []>} : vector<16x8xf32>, vector<8x32xf32>, vector<16x32xf32> -> vector<16x32xf32>
    %67 = arith.addf %47, %66 : vector<16x32xf32>
    %68 = vector.extract_strided_slice %26 {offsets = [0, 16], sizes = [16, 8], strides = [1, 1]} : vector<16x32xf32> to vector<16x8xf32>
    %69 = vector.extract_strided_slice %19 {offsets = [0, 16], sizes = [16, 8], strides = [1, 1]} : vector<16x32xf32> to vector<16x8xf32>
    %70 = vector.extract_strided_slice %24 {offsets = [0, 16], sizes = [16, 8], strides = [1, 1]} : vector<16x32xf32> to vector<16x8xf32>
    %cst_42 = arith.constant dense<0.000000e+00> : vector<16x16xf32>
    %71 = tpu.matmul %68, %69, %cst_42 {dimension_numbers = #tpu.dot_dimension_numbers<[1], [1], [0], [0], [0, 0, 1, 0], [], []>} : vector<16x8xf32>, vector<16x8xf32>, vector<16x16xf32> -> vector<16x16xf32>
    %cst_43 = arith.constant dense<0xFF800000> : vector<16xf32>
    %72 = vector.multi_reduction <maximumf>, %71, %cst_43 [1] : vector<16x16xf32> to vector<16xf32>
    %73 = vector.shape_cast %72 : vector<16xf32> to vector<16x1xf32>
    %74 = vector.broadcast %73 : vector<16x1xf32> to vector<16x16xf32>
    %75 = arith.subf %71, %74 : vector<16x16xf32>
    %76 = math.exp %75 : vector<16x16xf32>
    %cst_44 = arith.constant dense<0.000000e+00> : vector<16xf32>
    %77 = vector.multi_reduction <add>, %76, %cst_44 [1] : vector<16x16xf32> to vector<16xf32>
    %78 = vector.shape_cast %77 : vector<16xf32> to vector<16x1xf32>
    %cst_45 = arith.constant 1.000000e+00 : f32
    %79 = vector.broadcast %cst_45 : f32 to vector<16x1xf32>
    %80 = arith.divf %79, %78 : vector<16x1xf32>
    %cst_46 = arith.constant dense<0.000000e+00> : vector<16x8xf32>
    %81 = tpu.matmul %76, %70, %cst_46 {dimension_numbers = #tpu.dot_dimension_numbers<[1], [0], [0], [1], [0, 0, 1, 1], [], []>} : vector<16x16xf32>, vector<16x8xf32>, vector<16x8xf32> -> vector<16x8xf32>
    %82 = vector.broadcast %80 : vector<16x1xf32> to vector<16x8xf32>
    %83 = arith.mulf %81, %82 : vector<16x8xf32>
    %c3_47 = arith.constant 3 : index
    %c16 = arith.constant 16 : index
    %c0_48 = arith.constant 0 : index
    %84 = vector.load %arg4[%c3_47, %c16, %c0_48] : memref<4x32x32xf32, #tpu.memory_space<vmem>>, vector<1x8x32xf32>
    %85 = vector.shape_cast %84 : vector<1x8x32xf32> to vector<8x32xf32>
    %cst_49 = arith.constant dense<0.000000e+00> : vector<16x32xf32>
    %86 = tpu.matmul %83, %85, %cst_49 {dimension_numbers = #tpu.dot_dimension_numbers<[1], [0], [0], [1], [0, 0, 1, 1], [], []>} : vector<16x8xf32>, vector<8x32xf32>, vector<16x32xf32> -> vector<16x32xf32>
    %87 = arith.addf %67, %86 : vector<16x32xf32>
    %88 = vector.extract_strided_slice %26 {offsets = [0, 24], sizes = [16, 8], strides = [1, 1]} : vector<16x32xf32> to vector<16x8xf32>
    %89 = vector.extract_strided_slice %19 {offsets = [0, 24], sizes = [16, 8], strides = [1, 1]} : vector<16x32xf32> to vector<16x8xf32>
    %90 = vector.extract_strided_slice %24 {offsets = [0, 24], sizes = [16, 8], strides = [1, 1]} : vector<16x32xf32> to vector<16x8xf32>
    %cst_50 = arith.constant dense<0.000000e+00> : vector<16x16xf32>
    %91 = tpu.matmul %88, %89, %cst_50 {dimension_numbers = #tpu.dot_dimension_numbers<[1], [1], [0], [0], [0, 0, 1, 0], [], []>} : vector<16x8xf32>, vector<16x8xf32>, vector<16x16xf32> -> vector<16x16xf32>
    %cst_51 = arith.constant dense<0xFF800000> : vector<16xf32>
    %92 = vector.multi_reduction <maximumf>, %91, %cst_51 [1] : vector<16x16xf32> to vector<16xf32>
    %93 = vector.shape_cast %92 : vector<16xf32> to vector<16x1xf32>
    %94 = vector.broadcast %93 : vector<16x1xf32> to vector<16x16xf32>
    %95 = arith.subf %91, %94 : vector<16x16xf32>
    %96 = math.exp %95 : vector<16x16xf32>
    %cst_52 = arith.constant dense<0.000000e+00> : vector<16xf32>
    %97 = vector.multi_reduction <add>, %96, %cst_52 [1] : vector<16x16xf32> to vector<16xf32>
    %98 = vector.shape_cast %97 : vector<16xf32> to vector<16x1xf32>
    %cst_53 = arith.constant 1.000000e+00 : f32
    %99 = vector.broadcast %cst_53 : f32 to vector<16x1xf32>
    %100 = arith.divf %99, %98 : vector<16x1xf32>
    %cst_54 = arith.constant dense<0.000000e+00> : vector<16x8xf32>
    %101 = tpu.matmul %96, %90, %cst_54 {dimension_numbers = #tpu.dot_dimension_numbers<[1], [0], [0], [1], [0, 0, 1, 1], [], []>} : vector<16x16xf32>, vector<16x8xf32>, vector<16x8xf32> -> vector<16x8xf32>
    %102 = vector.broadcast %100 : vector<16x1xf32> to vector<16x8xf32>
    %103 = arith.mulf %101, %102 : vector<16x8xf32>
    %c3_55 = arith.constant 3 : index
    %c24 = arith.constant 24 : index
    %c0_56 = arith.constant 0 : index
    %104 = vector.load %arg4[%c3_55, %c24, %c0_56] : memref<4x32x32xf32, #tpu.memory_space<vmem>>, vector<1x8x32xf32>
    %105 = vector.shape_cast %104 : vector<1x8x32xf32> to vector<8x32xf32>
    %cst_57 = arith.constant dense<0.000000e+00> : vector<16x32xf32>
    %106 = tpu.matmul %103, %105, %cst_57 {dimension_numbers = #tpu.dot_dimension_numbers<[1], [0], [0], [1], [0, 0, 1, 1], [], []>} : vector<16x8xf32>, vector<8x32xf32>, vector<16x32xf32> -> vector<16x32xf32>
    %107 = arith.addf %87, %106 : vector<16x32xf32>
    %108 = vector.broadcast %7 : vector<1x32xf32> to vector<16x32xf32>
    %109 = arith.addf %107, %108 : vector<16x32xf32>
    %110 = arith.addf %1, %109 : vector<16x32xf32>
    %cst_58 = arith.constant dense<0.000000e+00> : vector<16xf32>
    %111 = vector.multi_reduction <add>, %110, %cst_58 [1] : vector<16x32xf32> to vector<16xf32>
    %112 = vector.shape_cast %111 : vector<16xf32> to vector<16x1xf32>
    %cst_59 = arith.constant 3.200000e+01 : f32
    %113 = vector.broadcast %cst_59 : f32 to vector<16x1xf32>
    %114 = arith.divf %112, %113 : vector<16x1xf32>
    %115 = vector.broadcast %114 : vector<16x1xf32> to vector<16x32xf32>
    %116 = arith.subf %110, %115 : vector<16x32xf32>
    %117 = arith.mulf %116, %116 : vector<16x32xf32>
    %cst_60 = arith.constant dense<0.000000e+00> : vector<16xf32>
    %118 = vector.multi_reduction <add>, %117, %cst_60 [1] : vector<16x32xf32> to vector<16xf32>
    %119 = vector.shape_cast %118 : vector<16xf32> to vector<16x1xf32>
    %cst_61 = arith.constant 3.200000e+01 : f32
    %120 = vector.broadcast %cst_61 : f32 to vector<16x1xf32>
    %121 = arith.divf %119, %120 : vector<16x1xf32>
    %cst_62 = arith.constant 9.99999974E-6 : f32
    %122 = vector.broadcast %cst_62 : f32 to vector<16x1xf32>
    %123 = arith.addf %121, %122 : vector<16x1xf32>
    %124 = math.rsqrt %123 : vector<16x1xf32>
    %125 = vector.broadcast %124 : vector<16x1xf32> to vector<16x32xf32>
    %126 = arith.mulf %116, %125 : vector<16x32xf32>
    %127 = vector.broadcast %8 : vector<1x32xf32> to vector<16x32xf32>
    %128 = arith.mulf %126, %127 : vector<16x32xf32>
    %129 = vector.broadcast %9 : vector<1x32xf32> to vector<16x32xf32>
    %130 = arith.addf %128, %129 : vector<16x32xf32>
    %c0_63 = arith.constant 0 : index
    %c0_64 = arith.constant 0 : index
    %c0_65 = arith.constant 0 : index
    %131 = vector.load %arg6[%c0_63, %c0_64, %c0_65] : memref<1x16x32xf32, #tpu.memory_space<vmem>>, vector<1x16x32xf32>
    %132 = vector.shape_cast %131 : vector<1x16x32xf32> to vector<16x32xf32>
    %133 = vector.shape_cast %130 : vector<16x32xf32> to vector<1x16x32xf32>
    tpu.vector_store %arg6[%c0_63, %c0_64, %c0_65], %133 {strides = array<i32>} : memref<1x16x32xf32, #tpu.memory_space<vmem>>, vector<1x16x32xf32>,
    return
  }
  func.func @transform_0(%arg0: i32, %arg1: i32) -> (i32, i32, i32) {
    %c0_i32 = arith.constant 0 : i32
    %c0_i32_0 = arith.constant 0 : i32
    return %arg0, %arg1, %c0_i32 : i32, i32, i32
  }
  func.func @transform_1(%arg0: i32, %arg1: i32) -> (i32, i32, i32) {
    %c0_i32 = arith.constant 0 : i32
    %c0_i32_0 = arith.constant 0 : i32
    %c0_i32_1 = arith.constant 0 : i32
    return %arg0, %c0_i32, %c0_i32_0 : i32, i32, i32
  }
  func.func @transform_2(%arg0: i32, %arg1: i32) -> (i32, i32, i32) {
    %c0_i32 = arith.constant 0 : i32
    %c0_i32_0 = arith.constant 0 : i32
    %c0_i32_1 = arith.constant 0 : i32
    %c0_i32_2 = arith.constant 0 : i32
    return %c0_i32, %c0_i32_0, %c0_i32_1 : i32, i32, i32
  }
  func.func @transform_3(%arg0: i32, %arg1: i32) -> (i32, i32) {
    %c0_i32 = arith.constant 0 : i32
    %c0_i32_0 = arith.constant 0 : i32
    %c0_i32_1 = arith.constant 0 : i32
    return %c0_i32, %c0_i32_0 : i32, i32
  }
  func.func @transform_4(%arg0: i32, %arg1: i32) -> (i32, i32, i32) {
    %c0_i32 = arith.constant 0 : i32
    %c0_i32_0 = arith.constant 0 : i32
    return %arg0, %arg1, %c0_i32 : i32, i32, i32
  }
}

</mosaic_0001>

<bundles_post_ra>
// kernel: tpu_custom_call.1
= control target key start
LH: loop header
LB: loop body
LE: loop exit
PB: predicated region body
PF: predicated region fallthrough
CT: control target
= control target key end

     0   :  { %s2893_s0 = inlined_call_operand.hbm [shape: f32[2,16,32], index: 0, kind: input, shape index: {}]   ;;  %s2894_s1 = inlined_call_operand.hbm [shape: f32[2,16,32], index: 1, kind: input, shape index: {}]   ;;  %s2895_s2 = inlined_call_operand.hbm [shape: f32[4,32,32], index: 2, kind: input, shape index: {}]   ;;  %s2896_s3 = inlined_call_operand.hbm [shape: f32[6,32], index: 3, kind: input, shape index: {}]   ;;  %s2897_s4 = inlined_call_operand.hbm [shape: f32[2,16,32], index: 4, kind: output, shape index: {}]  }
   0x1   :  { %2902 = sst [smem:[#allocation16_spill]] %s2893_s0 }
   0x2   :  { %2903 = sst [smem:[#allocation17_spill]] %s2894_s1 }
   0x3   :  { %2904 = sst [smem:[#allocation18_spill]] %s2895_s2 }
   0x4   :  { %9 = vsyncpa [#allocation3], 0 }
   0x5   :  { %11 = vsyncpa [#allocation3 + $0x1], 0 }
   0x6   :  { %12 = vsyncpa [#allocation6], 0 }
   0x7   :  { %14 = vsyncpa [#allocation6 + $0x1], 0 }
   0x8   :  { %15 = vsyncpa [#allocation9], 0 }
   0x9   :  { %16 = vsyncpa [#allocation4], 0 }
   0xa   :  { %18 = vsyncpa [#allocation4 + $0x1], 0  ;;  %s2519_s15 = smov 0   ;;  %s2521_s16 = smov 0  }
   0xb   :  { %s2523_s17 = smov 0   ;;  %s2525_s18 = smov 0  }
   0xc   :  { %s2527_s19 = smov 0   ;;  %s2529_s20 = smov 0  }
   0xd LB: > { %s2550_s21 = sadd.s32 4294967295, %s2480_s20   ;;  %s1909_s22 = sadd.s32 4294967294, %s2480_s20   ;;  %s2480_s20 = sphi %s2529_s20, %s24_s20   ;;  %s2476_s19 = sphi %s2527_s19, %s2921_s19   ;;  %s2472_s18 = sphi %s2525_s18, %s2920_s18   ;;  %s2468_s17 = sphi %s2523_s17, %s2919_s17   ;;  %s2464_s16 = sphi %s2521_s16, %s2918_s16   ;;  %s2460_s15 = sphi %s2519_s15, %s2917_s15  }
   0xe   : > { %p58_p0 = scmp.ne.s32.totalorder %s2464_s16, %s2460_s15  ;;  %p59_p1 = scmp.eq.s32.totalorder %s2550_s21, 0 }
   0xf   : > { %p152_p2 = scmp.eq.s32.totalorder %s2550_s21, 1  ;;  %p158_p3 = scmp.eq.s32.totalorder %s1909_s22, 1 }
  0x10   : > { %p2559_p4 = por %p59_p1, %p58_p0  ;;  %p1910_p5 = scmp.ge.s32.totalorder %s2480_s20, 1 }
  0x11   : > { %p2564_p6 = por %p158_p3, %p58_p0  ;;  %p165_p7 = scmp.lt.s32.totalorder %s2480_s20, 3 }
  0x12   : > { %s2482_s26 = smov [#allocation7]   ;;  %s2483_s29 = smov [#allocation8]  }
  0x13   : > { %p2569_p8 = pnand %p1910_p5, %p165_p7  ;;  %s177_s27 = sshll.u32 %s2482_s26, 4  ;;  %s178_s27 = int_to_ptr.vmem [resolvable:$true] %s177_s27 }
  0x14   : > { %s191_s30 = sshll.u32 %s2483_s29, 4  ;;  %s2291_s5 = scalar_lea.vmem %s178_s27, 2048  ;;  %s192_s30 = int_to_ptr.vmem [resolvable:$true] %s191_s30 }
  0x15   : > { %p2163_p9 = pneg %p2569_p8  ;;  %p2292_p13 = scmp.ne.s32.totalorder %s178_s27, %s2291_s5 }
  0x16   : > { %p2299_p5 = scmp.lt.s32.totalorder %s178_s27, %s178_s27  ;;  %p2300_p7 = scmp.lt.s32.totalorder %s2291_s5, %s2291_s5 }
  0x17   : > { %p2578_p11 = pnand %p2163_p9, %p59_p1 }
  0x18   : > { %p2301_p10 = por %p2300_p7, %p2299_p5 }
  0x19   : > { %p2282_p12 = pneg %p2578_p11 }
  0x1b   : > { %p2294_p0 = pnand %p2292_p13, %p2282_p12 }
  0x1d   : > { %p2295_p3 = pneg %p2294_p0 }
  0x1f   : > { %p2302_p9 = pnand %p2301_p10, %p2295_p3 }
  0x21   : > { %2305 = shalt.err (!%p2302_p9)
}
  0x22   : > { %s2898_s6 = smov 128   ;;  %s2900_s7 = smov 8  }
  0x23   : > { %s2909_s2 = sld [smem:[#allocation18_spill]]  ;;  %s2317_s10 = scalar_lea.vmem %s192_s30, 128 }
  0x24   : > { %p2318_p13 = scmp.ne.s32.totalorder %s192_s30, %s2317_s10  ;;  %p2325_p10 = scmp.lt.s32.totalorder %s192_s30, %s192_s30 }
  0x25   : > { %p2326_p3 = scmp.lt.s32.totalorder %s2317_s10, %s2317_s10 }
  0x26   : > { %p2320_p0 = pnand %p2318_p13, %p2282_p12 }
  0x27   : > { %p2327_p7 = por %p2326_p3, %p2325_p10 }
  0x28   : > { %p2321_p5 = pneg %p2320_p0 }
  0x29   : > { %2166 = dma.hbm_to_vmem [thread:$0]  (!%p2578_p11), %s2909_s2, 2048, %s178_s27, [#allocation6], %s2898_s6, %s2898_s6, %s2900_s7  }
  0x2a   : > { %p2328_p9 = pnand %p2327_p7, %p2321_p5 }
  0x2c   : > { %2331 = shalt.err (!%p2328_p9)
}
  0x2d   : > { %2169 = dma.hbm_to_vmem [thread:$0]  (!%p2578_p11), %s2896_s3, 128, %s192_s30, [#allocation9]  }
  0x2e   : > { %s36_s13 = sadd.s32 1, %s2476_s19  ;;  %s45_s14 = sadd.s32 1, %s2468_s17 }
  0x2f   : > { %p38_p12 = scmp.ge.s32.totalorder %s36_s13, 2  ;;  %p52_p13 = scmp.ne.s32.totalorder %s2468_s17, %s2464_s16 }
  0x30   : > { %p53_p0 = scmp.eq.s32.totalorder %s2480_s20, 0  ;;  %p2183_p5 = scmp.lt.s32.totalorder %s2480_s20, 2 }
  0x31   : > { %s2923_s13 = smov (%p38_p12, %s36_s13), 0  ;;  %p2613_p3 = por %p152_p2, %p52_p13 }
  0x32   : > { %p54_p10 = por %p53_p0, %p52_p13  ;;  %s40_s26 = ssub.s32 %s2476_s19, %s2923_s13 }
  0x33   : > { %s202_s27 = sand.u32 1, %s2468_s17   ;;  %p43_p7 = scmp.eq.s32.totalorder %s40_s26, 0 }
  0x34   : > { %s2620_s28 = sshll.u32 %s202_s27, 4  ;;  %s1975_s29 = sshll.u32 %s2476_s19, 8 }
  0x35   : > { %s2624_s30 = scalar_select %p43_p7, %s2468_s17, %s45_s14  }
  0x36   : > { %s2911_s0 = sld [smem:[#allocation16_spill]]  ;;  %s206_s10 = scalar_lea.vmem [#allocation2], %s2620_s28 }
  0x37   : > { %s215_s11 = sshll.u32 %s206_s10, 4  ;;  %p2632_p2 = pnand %p2183_p5, %p54_p10  ;;  %s216_s11 = int_to_ptr.vmem [resolvable:$true] %s215_s11 }
  0x38   : > { %s2913_s1 = sld [smem:[#allocation17_spill]]  ;;  %s203_s14 = scalar_lea.sflag [#allocation3], %s202_s27 }
  0x39   : > { %p2334_p11 = pneg %p2632_p2  ;;  %s2345_s5 = scalar_lea.vmem %s216_s11, 256 }
  0x3a   : > { %p2346_p9 = scmp.ne.s32.totalorder %s216_s11, %s2345_s5  ;;  %s2486_s8 = smov [#allocation2]  }
  0x3b   : > { %s2350_s10 = sshll.u32 %s2486_s8, 4  ;;  %s2351_s10 = int_to_ptr.vmem [resolvable:$false] %s2350_s10 }
  0x3c   : > { %s214_s9 = scalar_lea.hbm %s2911_s0, %s1975_s29  ;;  %p2348_p12 = pnand %p2346_p9, %p2334_p11 }
  0x3d   : > { %s2352_s0 = scalar_lea.vmem %s2351_s10, 512  ;;  %p2353_p0 = scmp.lt.s32.totalorder %s216_s11, %s2351_s10 }
  0x3e   : > { %s2639_s7 = scalar_lea.hbm %s2913_s1, %s1975_s29  ;;  %p2349_p13 = pneg %p2348_p12 }
  0x3f   : > { %p2354_p5 = scmp.lt.s32.totalorder %s2352_s0, %s2345_s5 }
  0x41   : > { %p2355_p10 = por %p2354_p5, %p2353_p0 }
  0x43   : > { %p2356_p7 = pnand %p2355_p10, %p2349_p13 }
  0x45   : > { %2359 = shalt.err (!%p2356_p7)
}
  0x46   : > { %s2914_s6 = smov 8   ;;  %s2915_s27 = smov 128  }
  0x47   : > { %2173 = dma.hbm_to_vmem [thread:$0]  (!%p2632_p2), %s214_s9, 256, %s216_s11, %s203_s14, %s2915_s27, %s2915_s27, %s2914_s6  }
  0x48   : > { %s229_s29 = scalar_lea.vmem [#allocation5], %s2620_s28  ;;  %s225_s1 = sand.u32 1, %s2480_s20  }
  0x49   : > { %s236_s26 = sshll.u32 %s229_s29, 4  ;;  %s226_s8 = scalar_lea.sflag [#allocation6], %s225_s1  ;;  %s237_s26 = int_to_ptr.vmem [resolvable:$true] %s236_s26 }
  0x4a   : > { %s2373_s2 = scalar_lea.vmem %s237_s26, 256  ;;  %s2487_s0 = smov [#allocation5]  }
  0x4b   : > { %p2374_p9 = scmp.ne.s32.totalorder %s237_s26, %s2373_s2  ;;  %s2378_s5 = sshll.u32 %s2487_s0, 4  ;;  %s2379_s5 = int_to_ptr.vmem [resolvable:$false] %s2378_s5 }
  0x4c   : > { %s2380_s10 = scalar_lea.vmem %s2379_s5, 512  ;;  %p2381_p0 = scmp.lt.s32.totalorder %s237_s26, %s2379_s5 }
  0x4d   : > { %p2376_p12 = pnand %p2374_p9, %p2334_p11  ;;  %p2382_p5 = scmp.lt.s32.totalorder %s2380_s10, %s2373_s2 }
  0x4f   : > { %p2377_p13 = pneg %p2376_p12  ;;  %p2383_p10 = por %p2382_p5, %p2381_p0 }
  0x51   : > { %p2384_p7 = pnand %p2383_p10, %p2377_p13 }
  0x53   : > { %2387 = shalt.err (!%p2384_p7)
}
  0x54   : > { %2176 = dma.hbm_to_vmem [thread:$0]  (!%p2632_p2), %s2639_s7, 256, %s237_s26, %s226_s8, %s2915_s27, %s2915_s27, %s2914_s6  }
  0x55   : > { %248 = sbr.rel (%p2569_p8) target bundleno = 2266 (0x8da), region = 36  ;;  %s2665_s1 = sand.u32 (!%p2569_p8), 1, %s2464_s16  }
  0x56   : > { %s2668_s2 = sshll.u32 (!%p2569_p8), %s2665_s1, 4  ;;  %s251_s28 = scalar_lea.sflag (!%p2569_p8), [#allocation3], %s2665_s1 }
  0x57   : > { %s254_s9 = scalar_lea.vmem (!%p2569_p8), [#allocation2], %s2668_s2 }
  0x5a   : > { %2439 = dma.done.wait (%p2559_p4), %s251_s28, 256  }
  0x5b   : > { %2441 = vsyncadd (%p2559_p4), %s251_s28, 4294967040  ;;  %s259_s25 = sand.u32 1, %s2550_s21   ;;  %s263_s11 = scalar_lea.vmem [#allocation5], %s2668_s2 }
  0x5c   : > { %s260_s7 = scalar_lea.sflag [#allocation6], %s259_s25 }
  0x5d   : > { %2443 = dma.done.wait (%p2559_p4), %s260_s7, 256  }
  0x5e   : > { %2445 = vsyncadd (%p2559_p4), %s260_s7, 4294967040 }
  0x5f   : > { %2447 = dma.done.wait (%p59_p1), [#allocation6], 2048  }
  0x60   : > { %2449 = vsyncadd (%p59_p1), [#allocation6], 4294965248 }
  0x61   : > { %2451 = dma.done.wait (%p59_p1), [#allocation9], 128  }
  0x62   : > { %2453 = vsyncadd (%p59_p1), [#allocation9], 4294967168  ;;  %v316_v0 = vld [vmem:[#allocation7 + $0x18] sm:$0xff]  ;;  %v315_v2 = vld [vmem:[#allocation7 + $0x10] sm:$0xff]  ;;  %vm321_vm0 = vcmask 261120   ;;  %vm579_vm1 = vcmask 64512  }
  0x63   : > { %v407_v1 = vld [vmem:[#allocation7 + $0x38] sm:$0xff]  ;;  %2040 = vmatprep.subr.mxu0 %v316_v0  ;;  %v406_v3 = vld [vmem:[#allocation7 + $0x30] sm:$0xff]  ;;  %v314_v4 = vld [vmem:[#allocation7 + $0x8] sm:$0xff]  ;;  %s2488_s21 = smov 120   ;;  %vm667_vm2 = vcmask 130048   ;;  %s2489_s23 = smov 112  }
  0x64   : > { %2051 = vmatprep.subr.mxu1 %v407_v1  ;;  %2041 = vmatpush3.msra.mxu0 %v316_v0  ;;  %v405_v5 = vld [vmem:[#allocation7 + $0x28] sm:$0xff]  ;;  %v313_v6 = vld [vmem:[#allocation7] sm:$0xff]  ;;  %v497_v12 = vld [vmem:[#allocation7 + $0x58] sm:$0xff]  ;;  %s2490_s12 = smov 104   ;;  %s1977_s14 = sshll.u32 %s2472_s18, 8 }
  0x65   : > { %2052 = vmatpush3.msra.mxu1 %v407_v1  ;;  %2042 = vmatprep.subr.mxu0 %v315_v2  ;;  %v404_v7 = vld [vmem:[#allocation7 + $0x20] sm:$0xff]  ;;  %v2698_v10 = vld [vmem:[%s254_s9 + $0x8] sm:$0xff]  ;;  %v496_v13 = vld [vmem:[#allocation7 + $0x50] sm:$0xff]  ;;  %s300_s6 = scalar_lea.vmem [#allocation10], %s2668_s2  ;;  %s2841_s8 = scalar_lea.hbm %s2897_s4, %s1977_s14 }
  0x66   : > { %2053 = vmatprep.subr.mxu1 %v406_v3  ;;  %2043 = vmatpush3.msra.mxu0 %v315_v2  ;;  %v2692_v8 = vld [vmem:[%s254_s9] sm:$0xff]  ;;  %v306_v11 = vld [vmem:[%s263_s11 + $0x8] sm:$0xff]  ;;  %s1779_s27 = sshll.u32 %s300_s6, 4  ;;  %s1764_s18 = scalar_lea.sflag [#allocation4], %s2665_s1  ;;  %s2843_s27 = int_to_ptr.vmem [resolvable:$true] %s1779_s27 }
  0x67   : > { %2054 = vmatpush3.msra.mxu1 %v406_v3  ;;  %2044 = vmatprep.subr.mxu0 %v314_v4  ;;  %v305_v9 = vld [vmem:[%s263_s11] sm:$0xff]  ;;  %v495_v14 = vld [vmem:[#allocation7 + $0x48] sm:$0xff]  ;;  %s2388_s0 = scalar_lea.vmem %s2843_s27, 256  ;;  %s2491_s5 = smov [#allocation10]  }
  0x68   : > { %2055 = vmatprep.subr.mxu1 %v405_v5  ;;  %2045 = vmatpush3.msra.mxu0 %v314_v4  ;;  %v494_v15 = vld [vmem:[#allocation7 + $0x40] sm:$0xff]  ;;  %v979_v61 = vld [vmem:[#allocation7 + $0x68] sm:$0xff]  ;;  %p2389_p1 = scmp.ne.s32.totalorder %s2843_s27, %s2388_s0  ;;  %s2392_s10 = sshll.u32 %s2491_s5, 4  ;;  %s2393_s10 = int_to_ptr.vmem [resolvable:$false] %s2392_s10 }
  0x69   : > { %2056 = vmatpush3.msra.mxu1 %v405_v5  ;;  %2046 = vmatprep.subr.mxu0 %v313_v6  ;;  %v1929_v16 = vld [vmem:[#allocation8 + $0x1] ss:$0 sm:$0xff]  ;;  %v1926_v20 = vld [vmem:[#allocation8] ss:$0 sm:$0xff]  ;;  %v1932_v28 = vld [vmem:[#allocation8 + $0x2] ss:$0 sm:$0xff]  ;;  %p2395_p2 = scmp.lt.s32.totalorder %s2843_s27, %s2393_s10 }
  0x6a   : > { %2057 = vmatprep.subr.mxu1 %v404_v7  ;;  %2047 = vmatpush3.msra.mxu0 %v313_v6  ;;  %v774_v5 = vld [vmem:[#allocation7 + $0x60] sm:$0xff]  ;;  %p2390_p4 = pnand %p2389_p1, %p2613_p3  ;;  %s2394_s2 = scalar_lea.vmem %s2393_s10, 512 }
  0x6b   : > { %2048 = vmatprep.mubr.msk.f32.mxu0 %vm321_vm0, %v2692_v8  ;;  %2058 = vmatpush3.msra.mxu1 %v404_v7  ;;  %p2396_p11 = scmp.lt.s32.totalorder %s2394_s2, %s2388_s0 }
  0x6c   : > { %2059 = vmatprep.mubr.msk.f32.mxu1 %vm321_vm0, %v305_v9  ;;  %2049 = vmatmul.mubr.msk.f32.vlgmr.msra.gmra.mxu0 %vm321_vm0, %v2698_v10  ;;  %p2391_p8 = pneg %p2390_p4 }
  0x6d   : > { %2060 = vmatmul.mubr.msk.f32.vlgmr.msra.gmra.mxu1 %vm321_vm0, %v306_v11  ;;  %2070 = vmatprep.mubr.msk.f32.mxu0 %vm321_vm0, %v305_v9  ;;  %p2397_p9 = por %p2396_p11, %p2395_p2 }
  0x6e   : > { %2062 = vmatprep.subr.mxu0 %v497_v12 }
  0x6f   : > { %2063 = vmatpush3.msra.mxu0 %v497_v12  ;;  %p2398_p12 = pnand %p2397_p9, %p2391_p8 }
  0x70   : > { %2064 = vmatprep.subr.mxu0 %v496_v13 }
  0x71   : > { %2065 = vmatpush3.msra.mxu0 %v496_v13 }
  0x72   : > { %2066 = vmatprep.subr.mxu0 %v495_v14 }
  0x73   : > { %2067 = vmatpush3.msra.mxu0 %v495_v14 }
  0x74   : > { %2068 = vmatprep.subr.mxu0 %v494_v15 }
  0x75   : > { %2069 = vmatpush3.msra.mxu0 %v494_v15 }
  0x76   : > { %2071 = vmatmul.mubr.msk.f32.vlgmr.msra.gmra.mxu0 %vm321_vm0, %v306_v11 }
 0x12c   : > { %v2050_v17 = vpop.f32.mrf.mxu0 }
 0x12d   : > { %v2061_v18 = vpop.f32.mrf.mxu1  ;;  %v400_v25 = vadd.f32 %v2050_v17, %v1926_v20 }
 0x12e   : > { %v2710_v19 = vadd.f32 %v2061_v18, %v1929_v16  ;;  %v394_v21 = vpop.f32.mrf.mxu0 }
 0x12f   : > { %v484_v22 = vpop.f32.mrf.mxu1  ;;  %v395_v23 = vadd.f32 %v1926_v20, %v394_v21  ;;  %v2732_v27 = vmul.f32 0.35355338, %v400_v25 }
 0x130   : > { %v2712_v24 = vadd.f32 %v1929_v16, %v484_v22  ;;  %781 = vrot.lane.b32.xlu0 %v2710_v19, %s2488_s21  ;;  %2073 = vmatprep.subr.msk.mxu1 %vm579_vm1, %v2710_v19 }
 0x131   : > { %2074 = vmatpush3.xpose.msk.msra.mxu1 %vm579_vm1, %v2710_v19  ;;  %v2720_v26 = vmul.f32 0.35355338, %v395_v23 }
 0x132   : > { %2075 = vmatprep.subr.msk.mxu1 %vm579_vm1, %v2712_v24 }
 0x133   : > { %775 = vrot.lane.b32.xlu1 %v2720_v26, %s2488_s21  ;;  %2077 = vmatprep.mubr.msk.f32.mxu1 %vm579_vm1, %v2720_v26 }
 0x134   : > { %779 = vrot.lane.b32.xlu0 %v2712_v24, %s2488_s21 }
 0x135   : > { %2076 = vmatpush3.xpose.msk.msra.mxu1 %vm579_vm1, %v2712_v24 }
 0x136   : > { %v2072_v29 = vpop.f32.mrf.mxu0 }
 0x137   : > { %777 = vrot.lane.b32.xlu1 %v2732_v27, %s2488_s21  ;;  %v2738_v30 = vadd.f32 %v2072_v29, %v1932_v28 }
 0x138   : > { %2078 = vmatmul.mubr.msk.f32.vlgmr.msra.gmra.mxu1 %vm579_vm1, %v2732_v27  ;;  %v568_v39 = vpop.f32.mrf.mxu0 }
 0x139   : > { %2080 = vmatprep.subr.mxu0 %v2738_v30  ;;  %v2754_v40 = vadd.f32 %v1932_v28, %v568_v39 }
 0x13a   : > { %2081 = vmatpush3.msra.mxu0 %v2738_v30 }
 0x13b   : > { %2082 = vmatprep.subr.mxu0 %v2754_v40 }
 0x13c   : > { %2083 = vmatpush3.msra.mxu0 %v2754_v40 }
 0x1a2   : > { %v782_v31 = vpop.permute.xlu0 %781 }
 0x1a3   : > { %2087 = vmatprep.subr.msk.mxu1 %vm579_vm1, %v782_v31 }
 0x1a4   : > { %2088 = vmatpush3.xpose.msk.msra.mxu1 %vm579_vm1, %v782_v31 }
 0x1a5   : > { %v776_v33 = vpop.permute.xlu1 %775 }
 0x1a6   : > { %v780_v32 = vpop.permute.xlu0 %779  ;;  %2091 = vmatprep.mubr.msk.f32.mxu1 %vm579_vm1, %v776_v33 }
 0x1a7   : > { %2089 = vmatprep.subr.msk.mxu1 %vm579_vm1, %v780_v32 }
 0x1a8   : > { %2090 = vmatpush3.xpose.msk.msra.mxu1 %vm579_vm1, %v780_v32 }
 0x1a9   : > { %v778_v34 = vpop.permute.xlu1 %777  ;;  %2106 = vmatprep.subr.mxu1 %v774_v5 }
 0x1ab   : > { %2092 = vmatmul.mubr.msk.f32.vlgmr.msra.gmra.mxu1 %vm579_vm1, %v778_v34 }
 0x1ac   : > { %2107 = vmatpush3.msra.mxu1 %v774_v5 }
 0x1f8   : > { %v2079_v35 = vpop.f32.mrf.mxu1 }
 0x1f9   : > { %v671_v36 = vsel %vm667_vm2, %v2079_v35, -inf }
 0x1fa   : > { %672 = vmax.xlane.f32.xlu1 %v671_v36  ;;  %v658_v37 = vpop.f32.mrf.mxu1 }
 0x1fb   : > { %v668_v38 = vsel %vm667_vm2, %v658_v37, -inf }
 0x1fc   : > { %669 = vmax.xlane.f32.xlu0 %v668_v38 }
 0x20b   : > { %892 = vrot.lane.b32.xlu1 %v2738_v30, %s2488_s21 }
 0x20f   : > { %1148 = vrot.lane.b32.xlu1 %v2710_v19, %s2489_s23 }
 0x213   : > { %1142 = vrot.lane.b32.xlu1 %v2720_v26, %s2489_s23 }
 0x26b   : > { %v2093_v41 = vpop.f32.mrf.mxu1 }
 0x26c   : > { %v869_v42 = vsel %vm667_vm2, %v2093_v41, -inf }
 0x26d   : > { %v857_v43 = vpop.f32.mrf.mxu1  ;;  %870 = vmax.xlane.f32.xlu0 %v869_v42 }
 0x26e   : > { %v866_v44 = vsel %vm667_vm2, %v857_v43, -inf }
 0x271   : > { %867 = vmax.xlane.f32.xlu0 %v866_v44 }
 0x283   : > { %v673_v45 = vpop.xlane.xlu1 %672 }
 0x284   : > { %v675_v46 = vsub.f32 %v2079_v35, %v673_v45 }
 0x285   : > { %v670_v47 = vpop.xlane.xlu0 %669 }
 0x286   : > { %v674_v48 = vsub.f32 %v658_v37, %v670_v47  ;;  %v678_v49 = vmul.f32 1.442695, %v675_v46 }
 0x287   : > { %v893_v50 = vpop.permute.xlu1 %892  ;;  %890 = vrot.lane.b32.xlu0 %v2754_v40, %s2488_s21 }
 0x288   : > { %v676_v51 = vmul.f32 1.442695, %v674_v48  ;;  %2094 = vmatprep.subr.mxu0 %v893_v50 }
 0x28a   : > { %2244 = vpow2.f32 %v676_v51 }
 0x28b   : > { %2246 = vpow2.f32 %v678_v49  ;;  %v1149_v2 = vpop.permute.xlu1 %1148 }
 0x28f   : > { %v1143_v6 = vpop.permute.xlu1 %1142 }
 0x297   : > { %v2245_v52 = vpop.eup %2244 }
 0x298   : > { %v2247_v53 = vpop.eup %2246  ;;  %2084 = vmatprep.mubr.msk.f32.mxu0 %vm667_vm2, %v2245_v52  ;;  %v680_v3 = vsel %vm667_vm2, %v2245_v52, 0.0 }
 0x299   : > { %2085 = vmatmul.mubr.msk.f32.vlgmr.msra.gmra.mxu0 %vm667_vm2, %v2247_v53  ;;  %v683_v4 = vsel %vm667_vm2, %v2247_v53, 0.0 }
 0x29a   : > { %2095 = vmatpush3.msra.mxu0 %v893_v50 }
 0x2f6   : > { %v871_v54 = vpop.xlane.xlu0 %870 }
 0x2f7   : > { %v873_v55 = vsub.f32 %v2093_v41, %v871_v54 }
 0x2f9   : > { %v876_v56 = vmul.f32 1.442695, %v873_v55 }
 0x2fa   : > { %v868_v57 = vpop.xlane.xlu0 %867 }
 0x2fb   : > { %2248 = vpow2.f32 %v876_v56  ;;  %v872_v58 = vsub.f32 %v857_v43, %v868_v57  ;;  %v1344_v57 = vld [vmem:[#allocation7 + $0x70] sm:$0xff] }
 0x2fd   : > { %v874_v59 = vmul.f32 1.442695, %v872_v58 }
 0x2fe   : > { %v891_v60 = vpop.permute.xlu0 %890 }
 0x2ff   : > { %2250 = vpow2.f32 %v874_v59  ;;  %2096 = vmatprep.subr.mxu0 %v891_v60 }
 0x300   : > { %2097 = vmatpush3.msra.mxu0 %v891_v60 }
 0x301   : > { %2101 = vmatprep.subr.mxu0 %v979_v61 }
 0x308   : > { %v2249_v62 = vpop.eup %2248 }
 0x309   : > { %v881_v63 = vsel %vm667_vm2, %v2249_v62, 0.0 }
 0x30a   : > { %882 = vadd.xlane.f32.xlu0 %v881_v63 }
 0x30c   : > { %v2251_v0 = vpop.eup %2250 }
 0x30d   : > { %2098 = vmatprep.mubr.msk.f32.mxu0 %vm667_vm2, %v2251_v0  ;;  %v878_v1 = vsel %vm667_vm2, %v2251_v0, 0.0 }
 0x30e   : > { %879 = vadd.xlane.f32.xlu1 %v878_v1  ;;  %2099 = vmatmul.mubr.msk.f32.vlgmr.msra.gmra.mxu0 %vm667_vm2, %v2249_v62 }
 0x30f   : > { %2102 = vmatpush3.msra.mxu0 %v979_v61 }
 0x310   : > { %2111 = vmatprep.subr.msk.mxu0 %vm579_vm1, %v1149_v2 }
 0x31f   : > { %1144 = vrot.lane.b32.xlu1 %v2732_v27, %s2489_s23 }
 0x320   : > { %1146 = vrot.lane.b32.xlu0 %v2712_v24, %s2489_s23 }
 0x323   : > { %1432 = vrot.lane.b32.xlu1 %v2712_v24, %s2490_s12 }
 0x324   : > { %1434 = vrot.lane.b32.xlu0 %v2710_v19, %s2490_s12 }
 0x327   : > { %1430 = vrot.lane.b32.xlu1 %v2732_v27, %s2490_s12 }
 0x328   : > { %1428 = vrot.lane.b32.xlu0 %v2720_v26, %s2490_s12 }
 0x347   : > { %681 = vadd.xlane.f32.xlu0 %v680_v3 }
 0x34b   : > { %684 = vadd.xlane.f32.xlu1 %v683_v4 }
 0x359   : > { %v2086_v14 = vpop.f32.mrf.mxu0 }
 0x35b   : > { %v762_v16 = vpop.f32.mrf.mxu0 }
 0x35c   : > { %1257 = vrot.lane.b32.xlu1 %v2738_v30, %s2489_s23 }
 0x393   : > { %v883_v7 = vpop.xlane.xlu0 %882 }
 0x397   : > { %v880_v9 = vpop.xlane.xlu1 %879  ;;  %v1147_v11 = vpop.permute.xlu0 %1146 }
 0x398   : > { %2252 = vrcp.f32 %v880_v9 }
 0x399   : > { %2254 = vrcp.f32 %v883_v7 }
 0x39b   : > { %v1145_v12 = vpop.permute.xlu1 %1144  ;;  %v1435_v13 = vpop.permute.xlu0 %1434 }
 0x39f   : > { %v1433_v15 = vpop.permute.xlu1 %1432  ;;  %v1429_v17 = vpop.permute.xlu0 %1428 }
 0x3a3   : > { %v1431_v19 = vpop.permute.xlu1 %1430 }
 0x3a5   : > { %v2253_v20 = vpop.eup %2252 }
 0x3a6   : > { %v2255_v23 = vpop.eup %2254 }
 0x3ce   : > { %v2100_v18 = vpop.f32.mrf.mxu0 }
 0x3cf   : > { %v978_v25 = vmul.f32 %v2255_v23, %v2100_v18 }
 0x3d0   : > { %v968_v21 = vpop.f32.mrf.mxu0  ;;  %v682_v22 = vpop.xlane.xlu0 %681 }
 0x3d1   : > { %v977_v24 = vmul.f32 %v2253_v20, %v968_v21  ;;  %2256 = vrcp.f32 %v682_v22 }
 0x3d3   : > { %2103 = vmatprep.mubr.msk.f32.mxu0 %vm579_vm1, %v977_v24 }
 0x3d4   : > { %v685_v26 = vpop.xlane.xlu1 %684  ;;  %2104 = vmatmul.mubr.msk.f32.vlgmr.msra.gmra.mxu0 %vm579_vm1, %v978_v25 }
 0x3d5   : > { %2258 = vrcp.f32 %v685_v26  ;;  %2112 = vmatpush3.xpose.msk.msra.mxu0 %vm579_vm1, %v1149_v2  ;;  %2115 = vmatprep.mubr.msk.f32.mxu0 %vm579_vm1, %v1143_v6 }
 0x3d6   : > { %2113 = vmatprep.subr.msk.mxu0 %vm579_vm1, %v1147_v11 }
 0x3d8   : > { %v1258_v27 = vpop.permute.xlu1 %1257 }
 0x3d9   : > { %2114 = vmatpush3.xpose.msk.msra.mxu0 %vm579_vm1, %v1147_v11  ;;  %2118 = vmatprep.subr.mxu1 %v1258_v27 }
 0x3da   : > { %2130 = vmatprep.subr.msk.mxu0 %vm579_vm1, %v1435_v13 }
 0x3dc   : > { %2116 = vmatmul.mubr.msk.f32.vlgmr.msra.gmra.mxu0 %vm579_vm1, %v1145_v12 }
 0x3dd   : > { %2131 = vmatpush3.xpose.msk.msra.mxu0 %vm579_vm1, %v1435_v13  ;;  %2134 = vmatprep.mubr.msk.f32.mxu0 %vm579_vm1, %v1429_v17 }
 0x3de   : > { %v2257_v28 = vpop.eup %2256  ;;  %2132 = vmatprep.subr.msk.mxu0 %vm579_vm1, %v1433_v15 }
 0x3df   : > { %v771_v29 = vmul.f32 %v2257_v28, %v762_v16 }
 0x3e1   : > { %2133 = vmatpush3.xpose.msk.msra.mxu0 %vm579_vm1, %v1433_v15  ;;  %2108 = vmatprep.mubr.msk.f32.mxu1 %vm579_vm1, %v771_v29  ;;  %v1630_v15 = vld [vmem:[#allocation7 + $0x78] sm:$0xff]  ;;  %v1967_v29 = vld [vmem:[#allocation8 + $0x3] ss:$0 sm:$0xff] }
 0x3e2   : > { %v2259_v31 = vpop.eup %2258 }
 0x3e3   : > { %v772_v32 = vmul.f32 %v2259_v31, %v2086_v14 }
 0x3e4   : > { %2135 = vmatmul.mubr.msk.f32.vlgmr.msra.gmra.mxu0 %vm579_vm1, %v1431_v19 }
 0x3e5   : > { %2109 = vmatmul.mubr.msk.f32.vlgmr.msra.gmra.mxu1 %vm579_vm1, %v772_v32 }
 0x3e6   : > { %2119 = vmatpush3.msra.mxu1 %v1258_v27 }
 0x494   : > { %v2105_v33 = vpop.f32.mrf.mxu0 }
 0x496   : > { %v2802_v34 = vpop.f32.mrf.mxu0 }
 0x49c   : > { %v2117_v35 = vpop.f32.mrf.mxu0 }
 0x49d   : > { %v1236_v36 = vsel %vm667_vm2, %v2117_v35, -inf }
 0x49e   : > { %1237 = vmax.xlane.f32.xlu0 %v1236_v36  ;;  %v1224_v37 = vpop.f32.mrf.mxu0 }
 0x49f   : > { %v1233_v38 = vsel %vm667_vm2, %v1224_v37, -inf }
 0x4a2   : > { %1234 = vmax.xlane.f32.xlu0 %v1233_v38 }
 0x4a4   : > { %v2136_v39 = vpop.f32.mrf.mxu0 }
 0x4a5   : > { %v2110_v41 = vpop.f32.mrf.mxu1  ;;  %v1522_v45 = vsel %vm667_vm2, %v2136_v39, -inf }
 0x4a6   : > { %v2806_v42 = vadd.f32 %v2110_v41, %v2105_v33  ;;  %v1510_v43 = vpop.f32.mrf.mxu0 }
 0x4a7   : > { %v1519_v44 = vsel %vm667_vm2, %v1510_v43, -inf  ;;  %v1133_v5 = vpop.f32.mrf.mxu1 }
 0x4a8   : > { %1520 = vmax.xlane.f32.xlu1 %v1519_v44  ;;  %v1134_v19 = vadd.f32 %v1133_v5, %v2802_v34 }
 0x4b8   : > { %1255 = vrot.lane.b32.xlu0 %v2754_v40, %s2489_s23 }
 0x4d7   : > { %1523 = vmax.xlane.f32.xlu0 %v1522_v45 }
 0x527   : > { %v1238_v46 = vpop.xlane.xlu0 %1237 }
 0x528   : > { %v1240_v47 = vsub.f32 %v2117_v35, %v1238_v46 }
 0x52a   : > { %v1243_v48 = vmul.f32 1.442695, %v1240_v47 }
 0x52b   : > { %v1235_v49 = vpop.xlane.xlu0 %1234 }
 0x52c   : > { %2260 = vpow2.f32 %v1243_v48  ;;  %v1239_v50 = vsub.f32 %v1224_v37, %v1235_v49 }
 0x52e   : > { %v1241_v51 = vmul.f32 1.442695, %v1239_v50 }
 0x52f   : > { %v1256_v52 = vpop.permute.xlu0 %1255 }
 0x530   : > { %2262 = vpow2.f32 %v1241_v51  ;;  %2120 = vmatprep.subr.mxu1 %v1256_v52 }
 0x531   : > { %2121 = vmatpush3.msra.mxu1 %v1256_v52  ;;  %v1521_v58 = vpop.xlane.xlu1 %1520 }
 0x532   : > { %2125 = vmatprep.subr.mxu1 %v1344_v57  ;;  %v1525_v59 = vsub.f32 %v1510_v43, %v1521_v58 }
 0x534   : > { %v1527_v60 = vmul.f32 1.442695, %v1525_v59 }
 0x536   : > { %2264 = vpow2.f32 %v1527_v60  ;;  %v1969_v60 = vld [vmem:[#allocation8 + $0x5] ss:$0 sm:$0xff] }
 0x539   : > { %v2261_v53 = vpop.eup %2260 }
 0x53a   : > { %v1248_v54 = vsel %vm667_vm2, %v2261_v53, 0.0 }
 0x53b   : > { %1249 = vadd.xlane.f32.xlu0 %v1248_v54 }
 0x53d   : > { %v2263_v55 = vpop.eup %2262 }
 0x53e   : > { %2122 = vmatprep.mubr.msk.f32.mxu1 %vm667_vm2, %v2263_v55  ;;  %v1245_v56 = vsel %vm667_vm2, %v2263_v55, 0.0 }
 0x53f   : > { %1246 = vadd.xlane.f32.xlu1 %v1245_v56  ;;  %2123 = vmatmul.mubr.msk.f32.vlgmr.msra.gmra.mxu1 %vm667_vm2, %v2261_v53 }
 0x540   : > { %2126 = vmatpush3.msra.mxu1 %v1344_v57  ;;  %v1968_v57 = vld [vmem:[#allocation8 + $0x4] ss:$0 sm:$0xff] }
 0x543   : > { %v2265_v0 = vpop.eup %2264 }
 0x544   : > { %v1531_v2 = vsel %vm667_vm2, %v2265_v0, 0.0 }
 0x550   : > { %1543 = vrot.lane.b32.xlu1 %v2738_v30, %s2490_s12 }
 0x551   : > { %1541 = vrot.lane.b32.xlu0 %v2754_v40, %s2490_s12 }
 0x560   : > { %v1524_v61 = vpop.xlane.xlu0 %1523 }
 0x561   : > { %v1526_v62 = vsub.f32 %v2136_v39, %v1524_v61 }
 0x563   : > { %v1529_v63 = vmul.f32 1.442695, %v1526_v62 }
 0x565   : > { %2266 = vpow2.f32 %v1529_v63 }
 0x572   : > { %v2267_v1 = vpop.eup %2266 }
 0x573   : > { %v1534_v3 = vsel %vm667_vm2, %v2267_v1, 0.0 }
 0x574   : > { %1532 = vadd.xlane.f32.xlu1 %v1531_v2  ;;  %1535 = vadd.xlane.f32.xlu0 %v1534_v3 }
 0x5c4   : > { %v1250_v40 = vpop.xlane.xlu0 %1249 }
 0x5c8   : > { %v1247_v30 = vpop.xlane.xlu1 %1246  ;;  %v1542_v14 = vpop.permute.xlu0 %1541 }
 0x5c9   : > { %2268 = vrcp.f32 %v1247_v30 }
 0x5ca   : > { %2270 = vrcp.f32 %v1250_v40 }
 0x5cc   : > { %v1544_v4 = vpop.permute.xlu1 %1543 }
 0x5cd   : > { %2137 = vmatprep.subr.mxu1 %v1544_v4 }
 0x5d6   : > { %v2269_v7 = vpop.eup %2268 }
 0x5d7   : > { %v2271_v11 = vpop.eup %2270 }
 0x5fd   : > { %v1533_v16 = vpop.xlane.xlu1 %1532  ;;  %v1536_v17 = vpop.xlane.xlu0 %1535 }
 0x5fe   : > { %2272 = vrcp.f32 %v1533_v16 }
 0x5ff   : > { %v2124_v6 = vpop.f32.mrf.mxu1  ;;  %2274 = vrcp.f32 %v1536_v17 }
 0x600   : > { %v1343_v13 = vmul.f32 %v2271_v11, %v2124_v6 }
 0x601   : > { %v1333_v9 = vpop.f32.mrf.mxu1 }
 0x602   : > { %v1342_v12 = vmul.f32 %v2269_v7, %v1333_v9 }
 0x604   : > { %2127 = vmatprep.mubr.msk.f32.mxu1 %vm579_vm1, %v1342_v12 }
 0x605   : > { %2128 = vmatmul.mubr.msk.f32.vlgmr.msra.gmra.mxu1 %vm579_vm1, %v1343_v13 }
 0x606   : > { %2138 = vmatpush3.msra.mxu1 %v1544_v4  ;;  %2141 = vmatprep.mubr.msk.f32.mxu1 %vm667_vm2, %v2265_v0 }
 0x607   : > { %2139 = vmatprep.subr.mxu1 %v1542_v14 }
 0x608   : > { %2140 = vmatpush3.msra.mxu1 %v1542_v14 }
 0x609   : > { %2142 = vmatmul.mubr.msk.f32.vlgmr.msra.gmra.mxu1 %vm667_vm2, %v2267_v1  ;;  %2144 = vmatprep.subr.mxu1 %v1630_v15 }
 0x60a   : > { %2145 = vmatpush3.msra.mxu1 %v1630_v15 }
 0x60b   : > { %v2273_v24 = vpop.eup %2272 }
 0x60c   : > { %v2275_v26 = vpop.eup %2274 }
 0x6c5   : > { %v2129_v18 = vpop.f32.mrf.mxu1 }
 0x6c6   : > { %v1427_v20 = vadd.f32 %v2129_v18, %v2806_v42 }
 0x6c7   : > { %v1417_v21 = vpop.f32.mrf.mxu1 }
 0x6c8   : > { %v1426_v22 = vadd.f32 %v1417_v21, %v1134_v19 }
 0x6c9   : > { %v2143_v23 = vpop.f32.mrf.mxu1 }
 0x6ca   : > { %v1629_v28 = vmul.f32 %v2275_v26, %v2143_v23 }
 0x6cb   : > { %v1619_v25 = vpop.f32.mrf.mxu1 }
 0x6cc   : > { %v1628_v27 = vmul.f32 %v2273_v24, %v1619_v25 }
 0x6ce   : > { %2146 = vmatprep.mubr.msk.f32.mxu1 %vm579_vm1, %v1628_v27 }
 0x6cf   : > { %2147 = vmatmul.mubr.msk.f32.vlgmr.msra.gmra.mxu1 %vm579_vm1, %v1629_v28 }
 0x78f   : > { %v2148_v31 = vpop.f32.mrf.mxu1 }
 0x790   : > { %v1713_v32 = vadd.f32 %v2148_v31, %v1427_v20 }
 0x791   : > { %v1703_v33 = vpop.f32.mrf.mxu1 }
 0x792   : > { %v1719_v35 = vadd.f32 %v1967_v29, %v1713_v32  ;;  %v1712_v34 = vadd.f32 %v1703_v33, %v1426_v22 }
 0x794   : > { %v1718_v36 = vadd.f32 %v1967_v29, %v1712_v34  ;;  %v1721_v37 = vadd.f32 %v1719_v35, %v2698_v10 }
 0x796   : > { %v1725_v38 = vsel %vm321_vm0, %v1721_v37, 0.0  ;;  %v1720_v39 = vadd.f32 %v1718_v36, %v2692_v8 }
 0x797   : > { %1726 = vadd.xlane.f32.xlu0 %v1725_v38 }
 0x798   : > { %v1722_v41 = vsel %vm321_vm0, %v1720_v39, 0.0 }
 0x799   : > { %1723 = vadd.xlane.f32.xlu1 %v1722_v41 }
 0x820   : > { %v1727_v42 = vpop.xlane.xlu0 %1726 }
 0x821   : > { %v1730_v43 = vmul.f32 0.03125, %v1727_v42 }
 0x822   : > { %v1724_v44 = vpop.xlane.xlu1 %1723 }
 0x823   : > { %v1732_v45 = vsub.f32 %v1721_v37, %v1730_v43  ;;  %v1729_v46 = vmul.f32 0.03125, %v1724_v44 }
 0x825   : > { %v1731_v47 = vsub.f32 %v1720_v39, %v1729_v46  ;;  %v1734_v48 = vmul.f32 %v1732_v45, %v1732_v45 }
 0x827   : > { %v1738_v49 = vsel %vm321_vm0, %v1734_v48, 0.0  ;;  %v1733_v50 = vmul.f32 %v1731_v47, %v1731_v47 }
 0x828   : > { %1739 = vadd.xlane.f32.xlu0 %v1738_v49 }
 0x829   : > { %v1735_v10 = vsel %vm321_vm0, %v1733_v50, 0.0 }
 0x82a   : > { %1736 = vadd.xlane.f32.xlu1 %v1735_v10 }
 0x8b1   : > { %v1740_v8 = vpop.xlane.xlu0 %1739 }
 0x8b2   : > { %v1742_v51 = vmul.f32 0.03125, %v1740_v8 }
 0x8b3   : > { %v1737_v52 = vpop.xlane.xlu1 %1736 }
 0x8b4   : > { %v1744_v53 = vadd.f32 1e-05, %v1742_v51  ;;  %v1741_v54 = vmul.f32 0.03125, %v1737_v52 }
 0x8b6   : > { %2276 = vrsqrt.f32 %v1744_v53  ;;  %v1743_v55 = vadd.f32 1e-05, %v1741_v54 }
 0x8b8   : > { %2278 = vrsqrt.f32 %v1743_v55 }
 0x8c3   : > { %v2277_v56 = vpop.eup %2276 }
 0x8c4   : > { %v1748_v58 = vmul.f32 %v2277_v56, %v1732_v45 }
 0x8c5   : > { %v2279_v59 = vpop.eup %2278 }
 0x8c6   : > { %v1754_v61 = vmul.f32 %v1968_v57, %v1748_v58  ;;  %v1747_v62 = vmul.f32 %v2279_v59, %v1731_v47 }
 0x8c8   : > { %v1760_v63 = vadd.f32 %v1969_v60, %v1754_v61  ;;  %v1753_v0 = vmul.f32 %v1968_v57, %v1747_v62 }
 0x8ca   : > { %v1759_v1 = vadd.f32 %v1969_v60, %v1753_v0  ;;  %1762 = vst.msk [vmem:[%s300_s6 + $0x8] sm:$0xff] %vm321_vm0, %v1760_v63 }
 0x8cc   : > { %1761 = vst.msk [vmem:[%s300_s6] sm:$0xff] %vm321_vm0, %v1759_v1 }
 0x8cd   : > { %2401 = shalt.err (!%p2398_p12)
}
 0x8ce   : > { %s2402_s28 = scalar_lea.hbm %s2841_s8, 256  ;;  %s2406_s7 = scalar_lea.hbm %s2897_s4, 512 }
 0x8cf   : > { %p2403_p13 = scmp.ne.s32.totalorder %s2841_s8, %s2402_s28  ;;  %p2407_p10 = scmp.lt.s32.totalorder %s2841_s8, %s2897_s4 }
 0x8d0   : > { %p2408_p7 = scmp.lt.s32.totalorder %s2406_s7, %s2402_s28 }
 0x8d1   : > { %p2404_p0 = pnand %p2403_p13, %p2613_p3 }
 0x8d2   : > { %p2409_p1 = por %p2408_p7, %p2407_p10 }
 0x8d3   : > { %p2405_p5 = pneg %p2404_p0 }
 0x8d5   : > { %p2410_p4 = pnand %p2409_p1, %p2405_p5 }
 0x8d7   : > { %2413 = shalt.err (!%p2410_p4)
}
 0x8d8   : > { %s2492_s23 = smov 128   ;;  %s2493_s12 = smov 8  }
 0x8d9   : > { %2161 = dma.vmem_to_hbm [thread:$0]  (%p2613_p3), %s2843_s27, 256, %s2841_s8, %s1764_s18, %s2492_s23, %s2492_s23, %s2493_s12  }
 0x8da PF: > { %s1794_s14 = sand.u32 1, %s2460_s15   ;;  %p2916_p8 = scmp.ge.s32.totalorder %s2480_s20, 2 }
 0x8db   : > { %s1795_s6 = scalar_lea.sflag [#allocation4], %s1794_s14 }
 0x8dc   : > { %p2178_p2 = pnand %p2916_p8, %p2564_p6 }
 0x8de   : > { %p2179_p11 = pneg %p2178_p2 }
 0x8e0   : > { %2455 = dma.done.wait (%p2179_p11), %s1795_s6, 256  }
 0x8e1   : > { %2457 = vsyncadd (%p2179_p11), %s1795_s6, 4294967040  ;;  %s24_s20 = sadd.s32 1, %s2480_s20   ;;  %s2917_s15 = smov %s2464_s16 }
 0x8e2   : > { %p21_p9 = scmp.ge.s32.totalorder %s24_s20, 4   ;;  %s2918_s16 = smov %s2468_s17 }
 0x8e3   : > { %s2919_s17 = smov %s2624_s30  ;;  %s2920_s18 = smov %s2476_s19 }
 0x8e4   : > { %s2921_s19 = smov %s2923_s13  ;;  %23 = sbr.rel (!%p21_p9) target bundleno = 13 (0xd), region = 105 }
 0x8e9   :  { %1800 = vsyncpa [#allocation3], 1 }
 0x8ea   :  { %1802 = vsyncpa [#allocation3 + $0x1], 1 }
 0x8eb   :  { %1803 = vsyncpa [#allocation6], 1 }
 0x8ec   :  { %1805 = vsyncpa [#allocation6 + $0x1], 1 }
 0x8ed   :  { %1806 = vsyncpa [#allocation9], 1 }
 0x8ee   :  { %1807 = vsyncpa [#allocation4], 1 }
 0x8ef   :  { %1809 = vsyncpa [#allocation4 + $0x1], 1 }

</bundles_post_ra>
